<compile_context>
chip_gen: v7x
topology: tpu7x:2x2x1
jax: 0.10.0
libtpu: 0.0.40
codegen_flags: <defaults>
</compile_context>

<pallas_src>
import functools
import math

import jax
import jax.numpy as jnp
from jax.experimental import pallas as pl
from jax.experimental.pallas import tpu as pltpu


# ---------------------------------------------------------------------------
# Kernels
# ---------------------------------------------------------------------------
def _fast_inv(x):
    """EUP approximate reciprocal + one Newton step; runs on the small
    (b, 1, T) denominator row (normalization is deferred), so the refinement
    is essentially free and restores full f32 accuracy."""
    r = pl.reciprocal(x, approx=True)
    return r * (2.0 - x * r)


def _attn_self_kernel(q_ref, k_ref, v_ref, o_ref, *, scale2, exp_dtype):
    # Blocks: q/k/v/o are (b_blk, ch, T).  Scores kept in (s, t) layout.
    q = q_ref[...]
    k = k_ref[...]
    v = v_ref[...]
    qs = q * jnp.asarray(scale2, dtype=q.dtype)          # fold 1/sqrt(ch) into Q once

    # w[b, s, t] = sum_c k[b, c, s] * q[b, c, t]   (MXU, f32 accumulation)
    w = jnp.einsum("bcs,bct->bst", k, qs, preferred_element_type=jnp.float32)

    m = jnp.max(w, axis=1, keepdims=True)                # (b, 1, T)
    e = jnp.exp((w - m).astype(exp_dtype))               # un-normalized weights
    l = jnp.sum(e, axis=1, keepdims=True, dtype=jnp.float32)

    # a[b, c, t] = sum_s v[b, c, s] * e[b, s, t]   (both operands MXU-native)
    a = jnp.einsum("bcs,bst->bct", v, e.astype(v.dtype),
                   preferred_element_type=jnp.float32)
    a = a * _fast_inv(l)                                 # deferred normalization
    o_ref[...] = a.astype(o_ref.dtype)


def _attn_cross_kernel(q_ref, k_ref, v_ref, ek_ref, ev_ref, o_ref, *,
                       scale2, exp_dtype):
    # Attention over [encoder_k | k] / [encoder_v | v] without materializing
    # the concat: two score blocks share one softmax and one deferred divide.
    q = q_ref[...]
    k = k_ref[...]
    v = v_ref[...]
    ek = ek_ref[...]
    ev = ev_ref[...]
    qs = q * jnp.asarray(scale2, dtype=q.dtype)

    w_e = jnp.einsum("bcs,bct->bst", ek, qs, preferred_element_type=jnp.float32)
    w_s = jnp.einsum("bcs,bct->bst", k, qs, preferred_element_type=jnp.float32)

    m = jnp.maximum(jnp.max(w_e, axis=1, keepdims=True),
                    jnp.max(w_s, axis=1, keepdims=True))
    e_e = jnp.exp((w_e - m).astype(exp_dtype))
    e_s = jnp.exp((w_s - m).astype(exp_dtype))
    l = (jnp.sum(e_e, axis=1, keepdims=True, dtype=jnp.float32) +
         jnp.sum(e_s, axis=1, keepdims=True, dtype=jnp.float32))

    a = (jnp.einsum("bcs,bst->bct", ev, e_e.astype(ev.dtype),
                    preferred_element_type=jnp.float32) +
         jnp.einsum("bcs,bst->bct", v, e_s.astype(v.dtype),
                    preferred_element_type=jnp.float32))
    a = a * _fast_inv(l)
    o_ref[...] = a.astype(o_ref.dtype)


def _online_update(qs, k, v, m_sc, l_sc, acc_sc, exp_dtype):
    """One online-softmax step over a (b, ch, s_tile) K/V tile."""
    w = jnp.einsum("bcs,bct->bst", k, qs, preferred_element_type=jnp.float32)
    m_prev = m_sc[...]
    m_new = jnp.maximum(m_prev, jnp.max(w, axis=1, keepdims=True))
    alpha = jnp.exp(m_prev - m_new)                      # (b, 1, T)
    e = jnp.exp((w - m_new).astype(exp_dtype))
    l_sc[...] = alpha * l_sc[...] + jnp.sum(e, axis=1, keepdims=True,
                                            dtype=jnp.float32)
    acc_sc[...] = alpha * acc_sc[...] + jnp.einsum(
        "bcs,bst->bct", v, e.astype(v.dtype), preferred_element_type=jnp.float32)
    m_sc[...] = m_new


def _flash_self_kernel(q_ref, k_ref, v_ref, o_ref, m_sc, l_sc, acc_sc, *,
                       scale2, exp_dtype):
    kv = pl.program_id(1)
    q = q_ref[...]
    qs = q * jnp.asarray(scale2, dtype=q.dtype)

    @pl.when(kv == 0)
    def _():
        m_sc[...] = jnp.full(m_sc.shape, -jnp.inf, m_sc.dtype)
        l_sc[...] = jnp.zeros(l_sc.shape, l_sc.dtype)
        acc_sc[...] = jnp.zeros(acc_sc.shape, acc_sc.dtype)

    _online_update(qs, k_ref[...], v_ref[...], m_sc, l_sc, acc_sc, exp_dtype)

    @pl.when(kv == pl.num_programs(1) - 1)
    def _():
        o_ref[...] = (acc_sc[...] * _fast_inv(l_sc[...])).astype(o_ref.dtype)


def _flash_cross_kernel(q_ref, k_ref, v_ref, ek_ref, ev_ref, o_ref,
                        m_sc, l_sc, acc_sc, *, scale2, exp_dtype):
    kv = pl.program_id(1)
    q = q_ref[...]
    qs = q * jnp.asarray(scale2, dtype=q.dtype)

    @pl.when(kv == 0)
    def _():
        # Fold the (VMEM-resident) encoder segment in once, initializing m/l/acc.
        ek = ek_ref[...]
        ev = ev_ref[...]
        w_e = jnp.einsum("bcs,bct->bst", ek, qs,
                         preferred_element_type=jnp.float32)
        m0 = jnp.max(w_e, axis=1, keepdims=True)
        e_e = jnp.exp((w_e - m0).astype(exp_dtype))
        m_sc[...] = m0
        l_sc[...] = jnp.sum(e_e, axis=1, keepdims=True, dtype=jnp.float32)
        acc_sc[...] = jnp.einsum("bcs,bst->bct", ev, e_e.astype(ev.dtype),
                                 preferred_element_type=jnp.float32)

    _online_update(qs, k_ref[...], v_ref[...], m_sc, l_sc, acc_sc, exp_dtype)

    @pl.when(kv == pl.num_programs(1) - 1)
    def _():
        o_ref[...] = (acc_sc[...] * _fast_inv(l_sc[...])).astype(o_ref.dtype)


# ---------------------------------------------------------------------------
# VMEM budgeting / block selection
# ---------------------------------------------------------------------------
def _vmem_budgets():
    try:
        cap = int(pltpu.get_tpu_info().vmem_capacity_bytes)
    except Exception:
        cap = 64 * 1024 * 1024               # conservative (v7x per-core VMEM)
    limit = (3 * cap) // 4                    # scoped-vmem limit we request
    budget = (11 * limit) // 20               # ~55%: headroom for compiler scratch
    return limit, budget


def _simple_footprint(b, *, ch, t, enc_len, itemsize, has_enc):
    # q, k, v, out (+ek, ev) double-buffered tiles.
    io = 2 * b * ch * (4 * t + 2 * enc_len) * itemsize
    s_total = t + enc_len
    score_copies = 5 if has_enc else 3        # w(+w_e), e(+e_e), broadcast temps
    score = score_copies * b * t * s_total * 4
    acc = b * ch * t * 4                      # f32 PV result before the store
    return io + score + acc


def _flash_footprint(b, *, ch, t, s_tile, enc_len, itemsize, has_enc):
    io = 2 * b * ch * (2 * t + 2 * s_tile + 2 * enc_len) * itemsize
    widest = max(s_tile, enc_len if has_enc else 0)
    score = 4 * b * t * widest * 4             # w, e, temps for one kv tile
    scratch = b * (ch * t + 2 * t) * 4         # acc + m + l carried in VMEM
    return io + score + scratch


def _pick_b_blk(bh, budget_bytes, footprint_fn):
    """Largest divisor of bh that fits the budget while keeping >=4 (else >=2)
    grid steps, so DMAs overlap and v7x's two TensorCores both get work."""
    divisors = [d for d in range(1, bh + 1) if bh % d == 0]
    for min_steps in (4, 2, 1):
        fits = [d for d in divisors
                if bh // d >= min_steps and footprint_fn(d) <= budget_bytes]
        if fits:
            return max(fits)
    return 1


# ---------------------------------------------------------------------------
# Wrapper
# ---------------------------------------------------------------------------
def qkv_attention(qkv, n_heads, encoder_kv=None, *, kv_block=None):
    """Pallas port of GLIDE QKVAttention.forward.

    qkv:        (bs, 3 * n_heads * ch, length)
    encoder_kv: optional (bs, 2 * n_heads * ch, enc_length)
    kv_block:   optional S-tile size; forces the flash (online-softmax) path.
    returns:    (bs, n_heads * ch, length)
    """
    bs, width, length = qkv.shape
    assert width % (3 * n_heads) == 0
    ch = width // (3 * n_heads)
    bh = bs * n_heads
    scale2 = 1.0 / math.sqrt(ch)              # (1/ch**0.25) applied to q and k
    itemsize = jnp.dtype(qkv.dtype).itemsize
    # bf16 exp hits the v6e/v7x EUP fast path; f32 row sums keep softmax stable.
    exp_dtype = jnp.bfloat16 if qkv.dtype == jnp.bfloat16 else jnp.float32

    qkv_r = qkv.reshape(bh, 3 * ch, length)   # free, contiguous reshape
    has_enc = encoder_kv is not None
    if has_enc:
        assert encoder_kv.shape[1] == 2 * n_heads * ch
        enc_len = encoder_kv.shape[-1]
        ekv_r = encoder_kv.reshape(bh, 2 * ch, enc_len)
    else:
        enc_len = 0
    s_total = length + enc_len

    vmem_limit, budget = _vmem_budgets()
    simple_fp = functools.partial(_simple_footprint, ch=ch, t=length,
                                  enc_len=enc_len, itemsize=itemsize,
                                  has_enc=has_enc)

    # ---- choose full-S kernel vs. flash-tiled (online softmax) kernel ------
    kv_cands = [d for d in range(128, length, 128) if length % d == 0]
    use_flash, s_tile = False, length
    if kv_block is not None and kv_block in kv_cands:
        use_flash, s_tile = True, kv_block
    elif kv_cands and simple_fp(1) > budget // 4:
        fits = [d for d in kv_cands if d <= 1024 and _flash_footprint(
            1, ch=ch, t=length, s_tile=d, enc_len=enc_len,
            itemsize=itemsize, has_enc=has_enc) <= budget]
        if fits:
            use_flash, s_tile = True, max(fits)
    # TODO(synk): if length is not a multiple of 128 and the full score block
    # still overflows the budget, pad length upstream instead of falling back.

    if use_flash:
        fp = functools.partial(_flash_footprint, ch=ch, t=length, s_tile=s_tile,
                               enc_len=enc_len, itemsize=itemsize,
                               has_enc=has_enc)
    else:
        fp = simple_fp
    b_blk = _pick_b_blk(bh, budget, fp)

    # ---- BlockSpecs ---------------------------------------------------------
    # Carving a ch-wide block out of the fused 3*ch axis needs ch % 8 == 0
    # (sublane tiling rule).  GLIDE uses ch = 64, so this is the normal path.
    fused_ok = (ch % 8 == 0)

    if use_flash:
        if fused_ok:
            q_in = k_in = v_in = qkv_r
            q_spec = pl.BlockSpec((b_blk, ch, length), lambda b, s: (b, 0, 0))
            k_spec = pl.BlockSpec((b_blk, ch, s_tile), lambda b, s: (b, 1, s))
            v_spec = pl.BlockSpec((b_blk, ch, s_tile), lambda b, s: (b, 2, s))
        else:
            q_in = qkv_r[:, 0 * ch:1 * ch, :]
            k_in = qkv_r[:, 1 * ch:2 * ch, :]
            v_in = qkv_r[:, 2 * ch:3 * ch, :]
            q_spec = pl.BlockSpec((b_blk, ch, length), lambda b, s: (b, 0, 0))
            k_spec = pl.BlockSpec((b_blk, ch, s_tile), lambda b, s: (b, 0, s))
            v_spec = pl.BlockSpec((b_blk, ch, s_tile), lambda b, s: (b, 0, s))
        out_spec = pl.BlockSpec((b_blk, ch, length), lambda b, s: (b, 0, 0))
        grid = (bh // b_blk, length // s_tile)
        dims = ("parallel", "arbitrary")
        scratch = [pltpu.VMEM((b_blk, 1, length), jnp.float32),   # m
                   pltpu.VMEM((b_blk, 1, length), jnp.float32),   # l
                   pltpu.VMEM((b_blk, ch, length), jnp.float32)]  # acc
    else:
        if fused_ok:
            q_in = k_in = v_in = qkv_r
            q_spec = pl.BlockSpec((b_blk, ch, length), lambda b: (b, 0, 0))
            k_spec = pl.BlockSpec((b_blk, ch, length), lambda b: (b, 1, 0))
            v_spec = pl.BlockSpec((b_blk, ch, length), lambda b: (b, 2, 0))
        else:
            q_in = qkv_r[:, 0 * ch:1 * ch, :]
            k_in = qkv_r[:, 1 * ch:2 * ch, :]
            v_in = qkv_r[:, 2 * ch:3 * ch, :]
            q_spec = pl.BlockSpec((b_blk, ch, length), lambda b: (b, 0, 0))
            k_spec = pl.BlockSpec((b_blk, ch, length), lambda b: (b, 0, 0))
            v_spec = pl.BlockSpec((b_blk, ch, length), lambda b: (b, 0, 0))
        out_spec = pl.BlockSpec((b_blk, ch, length), lambda b: (b, 0, 0))
        grid = (bh // b_blk,)
        dims = ("parallel",)
        scratch = []

    if has_enc:
        if use_flash:
            e_map0 = lambda b, s: (b, 0, 0)
            e_map1 = lambda b, s: (b, 1, 0)
        else:
            e_map0 = lambda b: (b, 0, 0)
            e_map1 = lambda b: (b, 1, 0)
        if fused_ok:
            ek_in = ev_in = ekv_r
            ek_spec = pl.BlockSpec((b_blk, ch, enc_len), e_map0)
            ev_spec = pl.BlockSpec((b_blk, ch, enc_len), e_map1)
        else:
            ek_in = ekv_r[:, :ch, :]
            ev_in = ekv_r[:, ch:, :]
            ek_spec = pl.BlockSpec((b_blk, ch, enc_len), e_map0)
            ev_spec = pl.BlockSpec((b_blk, ch, enc_len), e_map0)
        kernel_fn = _flash_cross_kernel if use_flash else _attn_cross_kernel
        in_specs = [q_spec, k_spec, v_spec, ek_spec, ev_spec]
        args = (q_in, k_in, v_in, ek_in, ev_in)
    else:
        kernel_fn = _flash_self_kernel if use_flash else _attn_self_kernel
        in_specs = [q_spec, k_spec, v_spec]
        args = (q_in, k_in, v_in)

    kernel = functools.partial(kernel_fn, scale2=scale2, exp_dtype=exp_dtype)

    cost = pl.CostEstimate(
        flops=int(4 * bh * length * s_total * ch),
        transcendentals=int(bh * length * s_total),
        bytes_accessed=int((qkv.size + (encoder_kv.size if has_enc else 0)
                            + bh * ch * length) * itemsize))

    a = pl.pallas_call(
        kernel,
        out_shape=jax.ShapeDtypeStruct((bh, ch, length), qkv.dtype),
        grid_spec=pltpu.PrefetchScalarGridSpec(
            num_scalar_prefetch=0,
            grid=grid,
            in_specs=in_specs,
            out_specs=out_spec,
            scratch_shapes=scratch,
        ),
        compiler_params=pltpu.CompilerParams(
            dimension_semantics=dims,
            vmem_limit_bytes=int(vmem_limit),
        ),
        cost_estimate=cost,
    )(*args)

    return a.reshape(bs, n_heads * ch, length)


# ---------------------------------------------------------------------------
# Pure-JAX reference (mirrors the PyTorch forward; high-precision matmuls)
# ---------------------------------------------------------------------------
def _reference(qkv, n_heads, encoder_kv=None):
    bs, width, length = qkv.shape
    ch = width // (3 * n_heads)
    qkv_r = qkv.reshape(bs * n_heads, ch * 3, length)
    q, k, v = qkv_r[:, :ch], qkv_r[:, ch:2 * ch], qkv_r[:, 2 * ch:]
    if encoder_kv is not None:
        ekv = encoder_kv.reshape(bs * n_heads, ch * 2, -1)
        k = jnp.concatenate([ekv[:, :ch], k], axis=-1)
        v = jnp.concatenate([ekv[:, ch:], v], axis=-1)
    scale = 1.0 / math.sqrt(math.sqrt(ch))
    w = jnp.einsum("bct,bcs->bts",
                   (q * scale).astype(jnp.float32),
                   (k * scale).astype(jnp.float32),
                   precision=jax.lax.Precision.HIGHEST)
    w = jax.nn.softmax(w, axis=-1).astype(qkv.dtype)
    a = jnp.einsum("bts,bcs->bct", w, v,
                   precision=jax.lax.Precision.HIGHEST,
                   preferred_element_type=jnp.float32).astype(qkv.dtype)
    return a.reshape(bs, -1, length)


if __name__ == "__main__":
    n_heads, ch = 4, 64                       # GLIDE-like head dim
    bs, length, enc_len = 2, 16, 8

    key = jax.random.PRNGKey(0)
    k1, k2, k3, k4 = jax.random.split(key, 4)
    qkv = jax.random.normal(k1, (bs, 3 * n_heads * ch, length), jnp.float32)
    ekv = jax.random.normal(k2, (bs, 2 * n_heads * ch, enc_len), jnp.float32)

    # 1) self-attention, full-S kernel
    out = jax.block_until_ready(qkv_attention(qkv, n_heads))
    ref = _reference(qkv, n_heads)
    assert out.shape == (bs, n_heads * ch, length)
    assert jnp.allclose(out, ref, atol=2e-3, rtol=2e-3), \
        float(jnp.max(jnp.abs(out - ref)))

    # 2) with encoder_kv (cross concat path), full-S kernel
    out = jax.block_until_ready(qkv_attention(qkv, n_heads, ekv))
    ref = _reference(qkv, n_heads, ekv)
    assert out.shape == (bs, n_heads * ch, length)
    assert jnp.allclose(out, ref, atol=2e-3, rtol=2e-3), \
        float(jnp.max(jnp.abs(out - ref)))

    # 3) flash-tiled (online softmax) path, forced via kv_block
    n_heads2, bs2, length2, enc_len2 = 2, 1, 256, 24
    qkv2 = jax.random.normal(k3, (bs2, 3 * n_heads2 * 64, length2), jnp.float32)
    ekv2 = jax.random.normal(k4, (bs2, 2 * n_heads2 * 64, enc_len2), jnp.float32)

    out = jax.block_until_ready(qkv_attention(qkv2, n_heads2, kv_block=128))
    ref = _reference(qkv2, n_heads2)
    assert jnp.allclose(out, ref, atol=2e-3, rtol=2e-3), \
        float(jnp.max(jnp.abs(out - ref)))

    out = jax.block_until_ready(qkv_attention(qkv2, n_heads2, ekv2, kv_block=128))
    ref = _reference(qkv2, n_heads2, ekv2)
    assert jnp.allclose(out, ref, atol=2e-3, rtol=2e-3), \
        float(jnp.max(jnp.abs(out - ref)))

    # 4) bf16 inputs (bf16 exp / MXU fast path) -- loose smoke-test tolerance
    out = jax.block_until_ready(
        qkv_attention(qkv.astype(jnp.bfloat16), n_heads,
                      ekv.astype(jnp.bfloat16))).astype(jnp.float32)
    ref = _reference(qkv, n_heads, ekv)
    assert jnp.allclose(out, ref, atol=1e-1, rtol=1e-1), \
        float(jnp.max(jnp.abs(out - ref)))

    print("KERNEL_OK")
</pallas_src>

<mosaic_0001>
module attributes {stable_mosaic.version = 11 : i64} {
  func.func @_attn_self_kernel(%arg0: i32, %arg1: memref<2x64x16xf32, #tpu.memory_space<vmem>>, %arg2: memref<2x64x16xf32, #tpu.memory_space<vmem>>, %arg3: memref<2x64x16xf32, #tpu.memory_space<vmem>>, %arg4: memref<2x64x16xf32, #tpu.memory_space<vmem>>) attributes {dimension_semantics = [#tpu.dimension_semantics<parallel>], iteration_bounds = array<i64: 4>, scalar_prefetch = 0 : i64, scratch_operands = 0 : i64, tpu.core_type = #tpu.core_type<tc>, window_params = [{transform_indices = @transform_0, window_bounds = array<i64: 2, 64, 16>}, {transform_indices = @transform_1, window_bounds = array<i64: 2, 64, 16>}, {transform_indices = @transform_2, window_bounds = array<i64: 2, 64, 16>}, {transform_indices = @transform_3, window_bounds = array<i64: 2, 64, 16>}]} {
    %c0 = arith.constant 0 : index
    %c0_0 = arith.constant 0 : index
    %c0_1 = arith.constant 0 : index
    %0 = vector.load %arg1[%c0, %c0_0, %c0_1] : memref<2x64x16xf32, #tpu.memory_space<vmem>>, vector<2x64x16xf32>
    %c0_2 = arith.constant 0 : index
    %c0_3 = arith.constant 0 : index
    %c0_4 = arith.constant 0 : index
    %1 = vector.load %arg2[%c0_2, %c0_3, %c0_4] : memref<2x64x16xf32, #tpu.memory_space<vmem>>, vector<2x64x16xf32>
    %c0_5 = arith.constant 0 : index
    %c0_6 = arith.constant 0 : index
    %c0_7 = arith.constant 0 : index
    %2 = vector.load %arg3[%c0_5, %c0_6, %c0_7] : memref<2x64x16xf32, #tpu.memory_space<vmem>>, vector<2x64x16xf32>
    %cst = arith.constant 1.250000e-01 : f32
    %3 = vector.broadcast %cst : f32 to vector<2x64x16xf32>
    %4 = arith.mulf %0, %3 : vector<2x64x16xf32>
    "tpu.trace_start"() <{level = 10 : i32, message = "bcs,bct->bst"}> : () -> ()
    %cst_8 = arith.constant dense<0.000000e+00> : vector<2x16x16xf32>
    %5 = tpu.matmul %1, %4, %cst_8 {dimension_numbers = #tpu.dot_dimension_numbers<[1], [1], [2], [2], [0, 0, 0, 2, 1, 2], [0], [0]>} : vector<2x64x16xf32>, vector<2x64x16xf32>, vector<2x16x16xf32> -> vector<2x16x16xf32>
    "tpu.trace_stop"() : () -> ()
    %cst_9 = arith.constant dense<0xFF800000> : vector<2x16xf32>
    %6 = vector.multi_reduction <maximumf>, %5, %cst_9 [1] : vector<2x16x16xf32> to vector<2x16xf32>
    %7 = vector.shape_cast %6 : vector<2x16xf32> to vector<2x1x16xf32>
    %8 = vector.broadcast %7 : vector<2x1x16xf32> to vector<2x16x16xf32>
    %9 = arith.subf %5, %8 : vector<2x16x16xf32>
    %10 = math.exp %9 : vector<2x16x16xf32>
    %cst_10 = arith.constant dense<0.000000e+00> : vector<2x16xf32>
    %11 = vector.multi_reduction <add>, %10, %cst_10 [1] : vector<2x16x16xf32> to vector<2x16xf32>
    %12 = vector.shape_cast %11 : vector<2x16xf32> to vector<2x1x16xf32>
    "tpu.trace_start"() <{level = 10 : i32, message = "bcs,bst->bct"}> : () -> ()
    %cst_11 = arith.constant dense<0.000000e+00> : vector<2x64x16xf32>
    %13 = tpu.matmul %2, %10, %cst_11 {dimension_numbers = #tpu.dot_dimension_numbers<[2], [1], [1], [2], [0, 0, 0, 1, 1, 2], [0], [0]>} : vector<2x64x16xf32>, vector<2x16x16xf32>, vector<2x64x16xf32> -> vector<2x64x16xf32>
    "tpu.trace_stop"() : () -> ()
    %14 = tpu.reciprocal %12 {approx = true} : vector<2x1x16xf32> -> vector<2x1x16xf32>
    %15 = arith.mulf %12, %14 : vector<2x1x16xf32>
    %cst_12 = arith.constant 2.000000e+00 : f32
    %16 = vector.broadcast %cst_12 : f32 to vector<2x1x16xf32>
    %17 = arith.subf %16, %15 : vector<2x1x16xf32>
    %18 = arith.mulf %14, %17 : vector<2x1x16xf32>
    %19 = vector.broadcast %18 : vector<2x1x16xf32> to vector<2x64x16xf32>
    %20 = arith.mulf %13, %19 : vector<2x64x16xf32>
    %c0_13 = arith.constant 0 : index
    %c0_14 = arith.constant 0 : index
    %c0_15 = arith.constant 0 : index
    %21 = vector.load %arg4[%c0_13, %c0_14, %c0_15] : memref<2x64x16xf32, #tpu.memory_space<vmem>>, vector<2x64x16xf32>
    tpu.vector_store %arg4[%c0_13, %c0_14, %c0_15], %20 {strides = array<i32>} : memref<2x64x16xf32, #tpu.memory_space<vmem>>, vector<2x64x16xf32>,
    return
  }
  func.func @transform_0(%arg0: i32) -> (i32, i32, i32) {
    %c0_i32 = arith.constant 0 : i32
    %c0_i32_0 = arith.constant 0 : i32
    %c0_i32_1 = arith.constant 0 : i32
    return %arg0, %c0_i32, %c0_i32_0 : i32, i32, i32
  }
  func.func @transform_1(%arg0: i32) -> (i32, i32, i32) {
    %c1_i32 = arith.constant 1 : i32
    %c0_i32 = arith.constant 0 : i32
    %c0_i32_0 = arith.constant 0 : i32
    return %arg0, %c1_i32, %c0_i32 : i32, i32, i32
  }
  func.func @transform_2(%arg0: i32) -> (i32, i32, i32) {
    %c2_i32 = arith.constant 2 : i32
    %c0_i32 = arith.constant 0 : i32
    %c0_i32_0 = arith.constant 0 : i32
    return %arg0, %c2_i32, %c0_i32 : i32, i32, i32
  }
  func.func @transform_3(%arg0: i32) -> (i32, i32, i32) {
    %c0_i32 = arith.constant 0 : i32
    %c0_i32_0 = arith.constant 0 : i32
    %c0_i32_1 = arith.constant 0 : i32
    return %arg0, %c0_i32, %c0_i32_0 : i32, i32, i32
  }
}

</mosaic_0001>

<bundles_post_ra>
// kernel: tpu_custom_call.1
= control target key start
LH: loop header
LB: loop body
LE: loop exit
PB: predicated region body
PF: predicated region fallthrough
CT: control target
= control target key end

     0   :  { %s1555_s12 = smov 0   ;;  %s1557_s13 = smov 0   ;;  %s1798_s0 = inlined_call_operand.vmem [shape: f32[8,192,16], index: 0, kind: input, shape index: {}]   ;;  %s1799_s1 = inlined_call_operand.vmem [shape: f32[8,192,16], index: 1, kind: input, shape index: {}]   ;;  %s1800_s2 = inlined_call_operand.vmem [shape: f32[8,192,16], index: 2, kind: input, shape index: {}]   ;;  %s1801_s3 = inlined_call_operand.vmem [shape: f32[8,64,16], index: 3, kind: output, shape index: {}]  }
   0x1   :  { %s1559_s14 = smov 0  }
   0x2 LB: > { %s1249_s15 = sadd.s32 4294967295, %s1533_s14   ;;  %s1572_s16 = sadd.s32 1, %s1533_s14   ;;  %s1533_s14 = sphi %s1559_s14, %s1805_s14   ;;  %s1529_s13 = sphi %s1557_s13, %s1804_s13   ;;  %s1525_s12 = sphi %s1555_s12, %s1803_s12  }
   0x3   : > { %s17_s17 = ssub.s32 %s1533_s14, %s1572_s16  ;;  %s20_s18 = sadd.s32 1, %s1529_s13 }
   0x4   : > { %p18_p0 = scmp.eq.s32.totalorder %s17_s17, 0  ;;  %p27_p1 = scmp.ne.s32.totalorder %s1529_s13, %s1525_s12 }
   0x5   : > { %p28_p2 = scmp.eq.s32.totalorder %s1533_s14, 0  ;;  %p1252_p4 = scmp.ge.s32.totalorder %s1533_s14, 4 }
   0x6   : > { %s1581_s19 = scalar_select %p18_p0, %s1529_s13, %s20_s18  }
   0x7   : > { %p1583_p3 = por %p28_p2, %p27_p1  ;;  %131 = sbr.rel (%p1252_p4) target bundleno = 53 (0x35), region = 16 }
   0xe   : > { %134 = sbr.rel (!%p1583_p3) target bundleno = 27 (0x1b), region = 20  ;;  %s136_s21 = sand.u32 (%p1583_p3), 1, %s1529_s13  }
   0xf   : > { %s1473_s22 = smul.u32 (%p1583_p3), 384, %s1533_s14  ;;  %s1253_s23 = sshll.u32 (%p1583_p3), %s136_s21, 7 }
  0x10   : > { %s138_s27 = scalar_lea.vmem (%p1583_p3), [#allocation2], %s1253_s23 }
  0x11   : > { %s1595_s26 = scalar_lea.vmem (%p1583_p3), %s1798_s0, %s1473_s22 }
  0x12   : > { %v200_v0 = vld [vmem:[%s1595_s26] sm:$0xff] (%p1583_p3)  ;;  %v202_v1 = vld [vmem:[%s1595_s26 + $0x8] sm:$0xff] (%p1583_p3)  ;;  %v204_v2 = vld [vmem:[%s1595_s26 + $0x10] sm:$0xff] (%p1583_p3) }
  0x13   : > { %201 = vst [vmem:[%s138_s27] sm:$0xff] (%p1583_p3), %v200_v0  ;;  %203 = vst [vmem:[%s138_s27 + $0x8] sm:$0xff] (%p1583_p3), %v202_v1  ;;  %v206_v3 = vld [vmem:[%s1595_s26 + $0x18] sm:$0xff] (%p1583_p3)  ;;  %v208_v4 = vld [vmem:[%s1595_s26 + $0x20] sm:$0xff] (%p1583_p3) }
  0x14   : > { %205 = vst [vmem:[%s138_s27 + $0x10] sm:$0xff] (%p1583_p3), %v204_v2  ;;  %v210_v5 = vld [vmem:[%s1595_s26 + $0x28] sm:$0xff] (%p1583_p3)  ;;  %207 = vst [vmem:[%s138_s27 + $0x18] sm:$0xff] (%p1583_p3), %v206_v3  ;;  %v212_v6 = vld [vmem:[%s1595_s26 + $0x30] sm:$0xff] (%p1583_p3) }
  0x15   : > { %209 = vst [vmem:[%s138_s27 + $0x20] sm:$0xff] %v208_v4  ;;  %211 = vst [vmem:[%s138_s27 + $0x28] sm:$0xff] %v210_v5  ;;  %v214_v7 = vld [vmem:[%s1595_s26 + $0x38] sm:$0xff]  ;;  %v216_v8 = vld [vmem:[%s1595_s26 + $0xc0] sm:$0xff] }
  0x16   : > { %213 = vst [vmem:[%s138_s27 + $0x30] sm:$0xff] %v212_v6  ;;  %215 = vst [vmem:[%s138_s27 + $0x38] sm:$0xff] %v214_v7  ;;  %v218_v9 = vld [vmem:[%s1595_s26 + $0xc8] sm:$0xff]  ;;  %v220_v10 = vld [vmem:[%s1595_s26 + $0xd0] sm:$0xff] }
  0x17   : > { %217 = vst [vmem:[%s138_s27 + $0x40] sm:$0xff] %v216_v8  ;;  %v222_v11 = vld [vmem:[%s1595_s26 + $0xd8] sm:$0xff]  ;;  %219 = vst [vmem:[%s138_s27 + $0x48] sm:$0xff] %v218_v9  ;;  %v224_v12 = vld [vmem:[%s1595_s26 + $0xe0] sm:$0xff] }
  0x18   : > { %221 = vst [vmem:[%s138_s27 + $0x50] sm:$0xff] %v220_v10  ;;  %223 = vst [vmem:[%s138_s27 + $0x58] sm:$0xff] %v222_v11  ;;  %v226_v13 = vld [vmem:[%s1595_s26 + $0xe8] sm:$0xff]  ;;  %v228_v14 = vld [vmem:[%s1595_s26 + $0xf0] sm:$0xff] }
  0x19   : > { %225 = vst [vmem:[%s138_s27 + $0x60] sm:$0xff] %v224_v12  ;;  %227 = vst [vmem:[%s138_s27 + $0x68] sm:$0xff] %v226_v13  ;;  %v230_v15 = vld [vmem:[%s1595_s26 + $0xf8] sm:$0xff] }
  0x1a   : > { %229 = vst [vmem:[%s138_s27 + $0x70] sm:$0xff] %v228_v14  ;;  %231 = vst [vmem:[%s138_s27 + $0x78] sm:$0xff] %v230_v15 }
  0x1b PF: > { %237 = sbr.rel (!%p1583_p3) target bundleno = 40 (0x28), region = 58  ;;  %s239_s28 = sand.u32 (%p1583_p3), 1, %s1529_s13  }
  0x1c   : > { %s1258_s29 = smul.u32 (%p1583_p3), 384, %s1533_s14  ;;  %s1257_s30 = sshll.u32 (%p1583_p3), %s239_s28, 7 }
  0x1d   : > { %s241_s7 = scalar_lea.vmem (%p1583_p3), [#allocation3], %s1257_s30 }
  0x1e   : > { %s1620_s6 = scalar_lea.vmem (%p1583_p3), %s1799_s1, %s1258_s29 }
  0x1f   : > { %v1259_v16 = vld [vmem:[%s1620_s6 + $0x40] sm:$0xff] (%p1583_p3)  ;;  %v1260_v17 = vld [vmem:[%s1620_s6 + $0x48] sm:$0xff] (%p1583_p3)  ;;  %v1261_v18 = vld [vmem:[%s1620_s6 + $0x50] sm:$0xff] (%p1583_p3) }
  0x20   : > { %305 = vst [vmem:[%s241_s7] sm:$0xff] (%p1583_p3), %v1259_v16  ;;  %307 = vst [vmem:[%s241_s7 + $0x8] sm:$0xff] (%p1583_p3), %v1260_v17  ;;  %v1262_v19 = vld [vmem:[%s1620_s6 + $0x58] sm:$0xff] (%p1583_p3)  ;;  %v1263_v20 = vld [vmem:[%s1620_s6 + $0x60] sm:$0xff] (%p1583_p3) }
  0x21   : > { %309 = vst [vmem:[%s241_s7 + $0x10] sm:$0xff] (%p1583_p3), %v1261_v18  ;;  %v1264_v21 = vld [vmem:[%s1620_s6 + $0x68] sm:$0xff] (%p1583_p3)  ;;  %311 = vst [vmem:[%s241_s7 + $0x18] sm:$0xff] (%p1583_p3), %v1262_v19  ;;  %v1265_v22 = vld [vmem:[%s1620_s6 + $0x70] sm:$0xff] (%p1583_p3) }
  0x22   : > { %313 = vst [vmem:[%s241_s7 + $0x20] sm:$0xff] %v1263_v20  ;;  %315 = vst [vmem:[%s241_s7 + $0x28] sm:$0xff] %v1264_v21  ;;  %v1266_v23 = vld [vmem:[%s1620_s6 + $0x78] sm:$0xff]  ;;  %v1267_v24 = vld [vmem:[%s1620_s6 + $0x100] sm:$0xff] }
  0x23   : > { %317 = vst [vmem:[%s241_s7 + $0x30] sm:$0xff] %v1265_v22  ;;  %319 = vst [vmem:[%s241_s7 + $0x38] sm:$0xff] %v1266_v23  ;;  %v1268_v25 = vld [vmem:[%s1620_s6 + $0x108] sm:$0xff]  ;;  %v1269_v26 = vld [vmem:[%s1620_s6 + $0x110] sm:$0xff] }
  0x24   : > { %321 = vst [vmem:[%s241_s7 + $0x40] sm:$0xff] %v1267_v24  ;;  %v1270_v27 = vld [vmem:[%s1620_s6 + $0x118] sm:$0xff]  ;;  %323 = vst [vmem:[%s241_s7 + $0x48] sm:$0xff] %v1268_v25  ;;  %v1271_v28 = vld [vmem:[%s1620_s6 + $0x120] sm:$0xff] }
  0x25   : > { %325 = vst [vmem:[%s241_s7 + $0x50] sm:$0xff] %v1269_v26  ;;  %327 = vst [vmem:[%s241_s7 + $0x58] sm:$0xff] %v1270_v27  ;;  %v1272_v29 = vld [vmem:[%s1620_s6 + $0x128] sm:$0xff]  ;;  %v1273_v30 = vld [vmem:[%s1620_s6 + $0x130] sm:$0xff] }
  0x26   : > { %329 = vst [vmem:[%s241_s7 + $0x60] sm:$0xff] %v1271_v28  ;;  %331 = vst [vmem:[%s241_s7 + $0x68] sm:$0xff] %v1272_v29  ;;  %v1274_v31 = vld [vmem:[%s1620_s6 + $0x138] sm:$0xff] }
  0x27   : > { %333 = vst [vmem:[%s241_s7 + $0x70] sm:$0xff] %v1273_v30  ;;  %335 = vst [vmem:[%s241_s7 + $0x78] sm:$0xff] %v1274_v31 }
  0x28 PF: > { %341 = sbr.rel (!%p1583_p3) target bundleno = 53 (0x35), region = 96  ;;  %s343_s8 = sand.u32 (%p1583_p3), 1, %s1529_s13  }
  0x29   : > { %s1276_s9 = smul.u32 (%p1583_p3), 384, %s1533_s14  ;;  %s1275_s10 = sshll.u32 (%p1583_p3), %s343_s8, 7 }
  0x2a   : > { %s345_s20 = scalar_lea.vmem (%p1583_p3), [#allocation4], %s1275_s10 }
  0x2b   : > { %s1645_s18 = scalar_lea.vmem (%p1583_p3), %s1800_s2, %s1276_s9 }
  0x2c   : > { %v1277_v32 = vld [vmem:[%s1645_s18 + $0x80] sm:$0xff] (%p1583_p3)  ;;  %v1278_v33 = vld [vmem:[%s1645_s18 + $0x88] sm:$0xff] (%p1583_p3)  ;;  %v1279_v34 = vld [vmem:[%s1645_s18 + $0x90] sm:$0xff] (%p1583_p3) }
  0x2d   : > { %409 = vst [vmem:[%s345_s20] sm:$0xff] (%p1583_p3), %v1277_v32  ;;  %411 = vst [vmem:[%s345_s20 + $0x8] sm:$0xff] (%p1583_p3), %v1278_v33  ;;  %v1280_v35 = vld [vmem:[%s1645_s18 + $0x98] sm:$0xff] (%p1583_p3)  ;;  %v1281_v36 = vld [vmem:[%s1645_s18 + $0xa0] sm:$0xff] (%p1583_p3) }
  0x2e   : > { %413 = vst [vmem:[%s345_s20 + $0x10] sm:$0xff] (%p1583_p3), %v1279_v34  ;;  %v1282_v37 = vld [vmem:[%s1645_s18 + $0xa8] sm:$0xff] (%p1583_p3)  ;;  %415 = vst [vmem:[%s345_s20 + $0x18] sm:$0xff] (%p1583_p3), %v1280_v35  ;;  %v1283_v38 = vld [vmem:[%s1645_s18 + $0xb0] sm:$0xff] (%p1583_p3) }
  0x2f   : > { %417 = vst [vmem:[%s345_s20 + $0x20] sm:$0xff] %v1281_v36  ;;  %419 = vst [vmem:[%s345_s20 + $0x28] sm:$0xff] %v1282_v37  ;;  %v1284_v39 = vld [vmem:[%s1645_s18 + $0xb8] sm:$0xff]  ;;  %v1285_v40 = vld [vmem:[%s1645_s18 + $0x140] sm:$0xff] }
  0x30   : > { %421 = vst [vmem:[%s345_s20 + $0x30] sm:$0xff] %v1283_v38  ;;  %423 = vst [vmem:[%s345_s20 + $0x38] sm:$0xff] %v1284_v39  ;;  %v1286_v41 = vld [vmem:[%s1645_s18 + $0x148] sm:$0xff]  ;;  %v1287_v42 = vld [vmem:[%s1645_s18 + $0x150] sm:$0xff] }
  0x31   : > { %425 = vst [vmem:[%s345_s20 + $0x40] sm:$0xff] %v1285_v40  ;;  %v1288_v43 = vld [vmem:[%s1645_s18 + $0x158] sm:$0xff]  ;;  %427 = vst [vmem:[%s345_s20 + $0x48] sm:$0xff] %v1286_v41  ;;  %v1289_v44 = vld [vmem:[%s1645_s18 + $0x160] sm:$0xff] }
  0x32   : > { %429 = vst [vmem:[%s345_s20 + $0x50] sm:$0xff] %v1287_v42  ;;  %431 = vst [vmem:[%s345_s20 + $0x58] sm:$0xff] %v1288_v43  ;;  %v1290_v45 = vld [vmem:[%s1645_s18 + $0x168] sm:$0xff]  ;;  %v1291_v46 = vld [vmem:[%s1645_s18 + $0x170] sm:$0xff] }
  0x33   : > { %433 = vst [vmem:[%s345_s20 + $0x60] sm:$0xff] %v1289_v44  ;;  %435 = vst [vmem:[%s345_s20 + $0x68] sm:$0xff] %v1290_v45  ;;  %v1292_v47 = vld [vmem:[%s1645_s18 + $0x178] sm:$0xff] }
  0x34   : > { %437 = vst [vmem:[%s345_s20 + $0x70] sm:$0xff] %v1291_v46  ;;  %439 = vst [vmem:[%s345_s20 + $0x78] sm:$0xff] %v1292_v47 }
  0x35 PF: > { %p1293_p5 = scmp.ge.s32.totalorder %s1533_s14, 1  ;;  %p444_p6 = scmp.lt.s32.totalorder %s1533_s14, 5 }
  0x37   : > { %p445_p7 = pnand %p1293_p5, %p444_p6 }
  0x38   : > { %s451_s21 = sand.u32 (!%p445_p7), 1, %s1525_s12   ;;  %vm603_vm0 = vcmask (!%p445_p7), 523264   ;;  %vm798_vm1 = vcmask (!%p445_p7), 130048   ;;  %s1297_s25 = sshll.u32 (!%p445_p7), %s1249_s15, 1 }
  0x39   : > { %448 = sbr.rel (%p445_p7) target bundleno = 674 (0x2a2), region = 134  ;;  %s1666_s22 = sshll.u32 (!%p445_p7), %s451_s21, 7 }
  0x3a   : > { %s1669_s23 = scalar_lea.vmem (!%p445_p7), [#allocation3], %s1666_s22  ;;  %s1678_s12 = scalar_lea.vmem (!%p445_p7), [#allocation2], %s1666_s22 }
  0x3b   : > { %v531_v48 = vld [vmem:[%s1669_s23 + $0x40] sm:$0xff] (!%p445_p7)  ;;  %v532_v50 = vld [vmem:[%s1669_s23 + $0x48] sm:$0xff] (!%p445_p7)  ;;  %v533_v52 = vld [vmem:[%s1669_s23 + $0x50] sm:$0xff] (!%p445_p7)  ;;  %s1707_s24 = scalar_lea.vmem (!%p445_p7), [#allocation4], %s1666_s22  ;;  %p501_p8 = scmp.lt.s32.totalorder (!%p445_p7), %s1297_s25, 7 }
  0x3c   : > { %v523_v49 = vld [vmem:[%s1669_s23] sm:$0xff] (!%p445_p7)  ;;  %685 = vxpose.xlu1.b32.start [1/8] (short) (narrow) (!%p445_p7), %v531_v48, 16  ;;  %v524_v51 = vld [vmem:[%s1669_s23 + $0x8] sm:$0xff] (!%p445_p7)  ;;  %v525_v53 = vld [vmem:[%s1669_s23 + $0x10] sm:$0xff] (!%p445_p7) }
  0x3d   : > { %571 = vxpose.xlu0.b32.start [1/8] (short) (narrow) (!%p445_p7), %v523_v49, 16  ;;  %v507_v54 = vld [vmem:[%s1678_s12] sm:$0xff] (!%p445_p7)  ;;  %v508_v55 = vld [vmem:[%s1678_s12 + $0x8] sm:$0xff] (!%p445_p7)  ;;  %v509_v60 = vld [vmem:[%s1678_s12 + $0x10] sm:$0xff] (!%p445_p7) }
  0x3e   : > { %v555_v56 = vmul.f32 (!%p445_p7), 0.125, %v507_v54  ;;  %v556_v57 = vmul.f32 (!%p445_p7), 0.125, %v508_v55  ;;  %v515_v58 = vld [vmem:[%s1678_s12 + $0x40] sm:$0xff] (!%p445_p7)  ;;  %v516_v59 = vld [vmem:[%s1678_s12 + $0x48] sm:$0xff] (!%p445_p7)  ;;  %v510_v63 = vld [vmem:[%s1678_s12 + $0x18] sm:$0xff] (!%p445_p7)  ;;  %v557_v0 = vmul.f32 (!%p445_p7), 0.125, %v509_v60 }
  0x3f   : > { %v563_v61 = vmul.f32 (!%p445_p7), 0.125, %v515_v58  ;;  %v564_v62 = vmul.f32 (!%p445_p7), 0.125, %v516_v59  ;;  %v517_v1 = vld [vmem:[%s1678_s12 + $0x50] sm:$0xff] (!%p445_p7)  ;;  %v518_v2 = vld [vmem:[%s1678_s12 + $0x58] sm:$0xff] (!%p445_p7)  ;;  %v558_v4 = vmul.f32 (!%p445_p7), 0.125, %v510_v63  ;;  %v511_v7 = vld [vmem:[%s1678_s12 + $0x20] sm:$0xff] (!%p445_p7) }
  0x40   : > { %686 = vxpose.xlu1.b32.cont [2/8] (short) (narrow) %v532_v50, 16  ;;  %v1433_v3 = vpack.c.bf16 %v556_v57, %v555_v56  ;;  %v565_v5 = vmul.f32 0.125, %v517_v1  ;;  %v566_v6 = vmul.f32 0.125, %v518_v2  ;;  %v512_v8 = vld [vmem:[%s1678_s12 + $0x28] sm:$0xff]  ;;  %v519_v9 = vld [vmem:[%s1678_s12 + $0x60] sm:$0xff]  ;;  %v534_v10 = vld [vmem:[%s1669_s23 + $0x58] sm:$0xff] }
  0x41   : > { %572 = vxpose.xlu0.b32.cont [2/8] (short) (narrow) %v524_v51, 16  ;;  %v1449_v11 = vpack.c.bf16 %v564_v62, %v563_v61  ;;  %v559_v12 = vmul.f32 0.125, %v511_v7  ;;  %v560_v13 = vmul.f32 0.125, %v512_v8  ;;  %v520_v14 = vld [vmem:[%s1678_s12 + $0x68] sm:$0xff]  ;;  %v526_v15 = vld [vmem:[%s1669_s23 + $0x18] sm:$0xff]  ;;  %v1437_v16 = vpack.c.bf16 %v558_v4, %v557_v0  ;;  %v513_v20 = vld [vmem:[%s1678_s12 + $0x30] sm:$0xff] }
  0x42   : > { %1434 = vmatprep.subr.bf16.mxu0 %v1433_v3  ;;  %v1453_v17 = vpack.c.bf16 %v566_v6, %v565_v5  ;;  %v567_v18 = vmul.f32 0.125, %v519_v9  ;;  %v568_v19 = vmul.f32 0.125, %v520_v14  ;;  %v514_v21 = vld [vmem:[%s1678_s12 + $0x38] sm:$0xff]  ;;  %v521_v22 = vld [vmem:[%s1678_s12 + $0x70] sm:$0xff]  ;;  %v561_v25 = vmul.f32 0.125, %v513_v20  ;;  %v535_v27 = vld [vmem:[%s1669_s23 + $0x60] sm:$0xff] }
  0x43   : > { %1450 = vmatprep.subr.bf16.mxu1 %v1449_v11  ;;  %1436 = vmatpush3.bf16.msra.mxu0 %v1433_v3  ;;  %v522_v23 = vld [vmem:[%s1678_s12 + $0x78] sm:$0xff]  ;;  %v1441_v24 = vpack.c.bf16 %v560_v13, %v559_v12  ;;  %v562_v26 = vmul.f32 0.125, %v514_v21  ;;  %v527_v28 = vld [vmem:[%s1669_s23 + $0x20] sm:$0xff]  ;;  %v569_v30 = vmul.f32 0.125, %v521_v22  ;;  %v536_v33 = vld [vmem:[%s1669_s23 + $0x68] sm:$0xff]  ;;  %s1807_s25 = smov (!%p501_p8, %s1297_s25), 7 }
  0x44   : > { %687 = vxpose.xlu1.b32.cont [3/8] (short) (narrow) %v533_v52, 16  ;;  %1452 = vmatpush3.bf16.msra.mxu1 %v1449_v11  ;;  %v1457_v29 = vpack.c.bf16 %v568_v19, %v567_v18  ;;  %v570_v31 = vmul.f32 0.125, %v522_v23  ;;  %v528_v34 = vld [vmem:[%s1669_s23 + $0x28] sm:$0xff]  ;;  %v537_v36 = vld [vmem:[%s1669_s23 + $0x70] sm:$0xff]  ;;  %v538_v38 = vld [vmem:[%s1669_s23 + $0x78] sm:$0xff]  ;;  %s1322_s26 = sshll.u32 %s1807_s25, 6 }
  0x45   : > { %573 = vxpose.xlu0.b32.cont [3/8] (short) (narrow) %v525_v53, 16  ;;  %1438 = vmatprep.subr.bf16.mxu0 %v1437_v16  ;;  %v1445_v32 = vpack.c.bf16 %v562_v26, %v561_v25  ;;  %v529_v37 = vld [vmem:[%s1669_s23 + $0x30] sm:$0xff]  ;;  %v530_v39 = vld [vmem:[%s1669_s23 + $0x38] sm:$0xff]  ;;  %v539_v44 = vld [vmem:[%s1707_s24] sm:$0xff]  ;;  %s1754_s29 = scalar_lea.vmem %s1801_s3, %s1322_s26 }
  0x46   : > { %1454 = vmatprep.subr.bf16.mxu1 %v1453_v17  ;;  %v1461_v35 = vpack.c.bf16 %v570_v31, %v569_v30  ;;  %v547_v45 = vld [vmem:[%s1707_s24 + $0x40] sm:$0xff]  ;;  %v541_v25 = vld [vmem:[%s1707_s24 + $0x10] sm:$0xff]  ;;  %v548_v26 = vld [vmem:[%s1707_s24 + $0x48] sm:$0xff] }
  0x47   : > { %1440 = vmatpush3.bf16.msra.mxu0 %v1437_v16  ;;  %v550_v30 = vld [vmem:[%s1707_s24 + $0x58] sm:$0xff]  ;;  %v551_v31 = vld [vmem:[%s1707_s24 + $0x60] sm:$0xff] }
  0x48   : > { %688 = vxpose.xlu1.b32.cont [4/8] (short) (narrow) %v534_v10, 16  ;;  %1456 = vmatpush3.bf16.msra.mxu1 %v1453_v17 }
  0x49   : > { %574 = vxpose.xlu0.b32.cont [4/8] (short) (narrow) %v526_v15, 16  ;;  %1442 = vmatprep.subr.bf16.mxu0 %v1441_v24 }
  0x4a   : > { %1458 = vmatprep.subr.bf16.mxu1 %v1457_v29 }
  0x4b   : > { %1444 = vmatpush3.bf16.msra.mxu0 %v1441_v24  ;;  %v540_v24 = vld [vmem:[%s1707_s24 + $0x8] sm:$0xff] }
  0x4c   : > { %689 = vxpose.xlu1.b32.cont [5/8] (short) (narrow) %v535_v27, 16  ;;  %1460 = vmatpush3.bf16.msra.mxu1 %v1457_v29  ;;  %v549_v27 = vld [vmem:[%s1707_s24 + $0x50] sm:$0xff]  ;;  %v543_v29 = vld [vmem:[%s1707_s24 + $0x20] sm:$0xff] }
  0x4d   : > { %575 = vxpose.xlu0.b32.cont [5/8] (short) (narrow) %v527_v28, 16  ;;  %1446 = vmatprep.subr.bf16.mxu0 %v1445_v32  ;;  %v542_v28 = vld [vmem:[%s1707_s24 + $0x18] sm:$0xff] }
  0x4e   : > { %1462 = vmatprep.subr.bf16.mxu1 %v1461_v35 }
  0x4f   : > { %1448 = vmatpush3.bf16.msra.mxu0 %v1445_v32  ;;  %v544_v32 = vld [vmem:[%s1707_s24 + $0x28] sm:$0xff] }
  0x50   : > { %690 = vxpose.xlu1.b32.cont [6/8] (short) (narrow) %v536_v33, 16  ;;  %1464 = vmatpush3.bf16.msra.mxu1 %v1461_v35  ;;  %v545_v33 = vld [vmem:[%s1707_s24 + $0x30] sm:$0xff] }
  0x51   : > { %576 = vxpose.xlu0.b32.cont [6/8] (short) (narrow) %v528_v34, 16  ;;  %v552_v34 = vld [vmem:[%s1707_s24 + $0x68] sm:$0xff]  ;;  %v553_v35 = vld [vmem:[%s1707_s24 + $0x70] sm:$0xff] }
  0x54   : > { %691 = vxpose.xlu1.b32.cont [7/8] (short) (narrow) %v537_v36, 16  ;;  %v546_v36 = vld [vmem:[%s1707_s24 + $0x38] sm:$0xff] }
  0x55   : > { %577 = vxpose.xlu0.b32.cont [7/8] (short) (narrow) %v529_v37, 16  ;;  %v554_v37 = vld [vmem:[%s1707_s24 + $0x78] sm:$0xff] }
  0x58   : > { %692 = vxpose.xlu1.b32.end [8/8] (short) (narrow) %v538_v38, 16 }
  0x59   : > { %578 = vxpose.xlu0.b32.end [8/8] (short) (narrow) %v530_v39, 16 }
  0xbc   : > { %v701_v40 = vpop.trf.xlu1 }
  0xbd   : > { %v587_v41 = vpop.trf.xlu0  ;;  %1398 = vmatprep.mubr.msk.f32.mxu1 %vm603_vm0, %v701_v40 }
  0xbe   : > { %1379 = vmatprep.mubr.msk.f32.mxu0 %vm603_vm0, %v587_v41 }
  0xc0   : > { %v702_v42 = vpop.trf.xlu1 }
  0xc1   : > { %v588_v43 = vpop.trf.xlu0  ;;  %1399 = vmatmul.mubr.msk.f32.vlgmr.msra.gmra.mrb[0].mxu1 %vm603_vm0, %v702_v42 }
  0xc2   : > { %1380 = vmatmul.mubr.msk.f32.vlgmr.msra.gmra.mrb[0].mxu0 %vm603_vm0, %v588_v43  ;;  %1421 = vmatprep.mubr.msk.f32.mxu1 %vm798_vm1, %v547_v45 }
  0xc3   : > { %1405 = vmatprep.mubr.msk.f32.mxu0 %vm798_vm1, %v539_v44 }
 0x194   : > { %v1400_v47 = vpop.f32.mrb[0].mxu1 }
 0x195   : > { %v1381_v46 = vpop.f32.mrb[0].mxu0  ;;  %v809_v49 = vsel %vm798_vm1, %v1400_v47, -inf  ;;  %v789_v51 = vpop.f32.mrb[1].mxu1 }
 0x196   : > { %v800_v48 = vsel %vm798_vm1, %v1381_v46, -inf  ;;  %v676_v50 = vpop.f32.mrb[1].mxu0  ;;  %v808_v53 = vsel %vm798_vm1, %v789_v51, -inf }
 0x197   : > { %v799_v52 = vsel %vm798_vm1, %v676_v50, -inf  ;;  %v810_v55 = vmax.f32 %v808_v53, %v809_v49 }
 0x198   : > { %v801_v54 = vmax.f32 %v799_v52, %v800_v48 }
 0x199   : > { %v811_v57 = vrot.slane %v810_v55, 4 }
 0x19a   : > { %v802_v56 = vrot.slane %v801_v54, 4 }
 0x19b   : > { %v812_v59 = vmax.f32 %v810_v55, %v811_v57 }
 0x19c   : > { %v803_v58 = vmax.f32 %v801_v54, %v802_v56 }
 0x19d   : > { %v813_v61 = vrot.slane %v812_v59, 2 }
 0x19e   : > { %v804_v60 = vrot.slane %v803_v58, 2 }
 0x19f   : > { %v814_v63 = vmax.f32 %v812_v59, %v813_v61 }
 0x1a0   : > { %v805_v62 = vmax.f32 %v803_v58, %v804_v60 }
 0x1a1   : > { %v815_v1 = vrot.slane %v814_v63, 1 }
 0x1a2   : > { %v806_v0 = vrot.slane %v805_v62, 1 }
 0x1a3   : > { %v816_v3 = vmax.f32 %v814_v63, %v815_v1 }
 0x1a4   : > { %v807_v2 = vmax.f32 %v805_v62, %v806_v0 }
 0x1a5   : > { %v819_v6 = vsub.f32 %v789_v51, %v816_v3  ;;  %v820_v7 = vsub.f32 %v1400_v47, %v816_v3 }
 0x1a6   : > { %v817_v4 = vsub.f32 %v676_v50, %v807_v2  ;;  %v818_v5 = vsub.f32 %v1381_v46, %v807_v2 }
 0x1a7   : > { %v825_v10 = vmul.f32 1.442695, %v819_v6  ;;  %v827_v11 = vmul.f32 1.442695, %v820_v7 }
 0x1a8   : > { %v821_v8 = vmul.f32 1.442695, %v817_v4  ;;  %v823_v9 = vmul.f32 1.442695, %v818_v5 }
 0x1aa   : > { %1499 = vpow2.f32 %v821_v8 }
 0x1ab   : > { %1501 = vpow2.f32 %v823_v9 }
 0x1ac   : > { %1503 = vpow2.f32 %v825_v10 }
 0x1ad   : > { %1505 = vpow2.f32 %v827_v11 }
 0x1b4   : > { %v1500_v12 = vpop.eup %1499 }
 0x1b5   : > { %v1502_v13 = vpop.eup %1501  ;;  %v829_v14 = vsel %vm798_vm1, %v1500_v12, 0.0 }
 0x1b6   : > { %v1504_v15 = vpop.eup %1503  ;;  %v830_v16 = vsel %vm798_vm1, %v1502_v13, 0.0  ;;  %v1465_v17 = vpack.c.bf16 %v1502_v13, %v1500_v12 }
 0x1b7   : > { %v1506_v18 = vpop.eup %1505  ;;  %v831_v19 = vadd.f32 %v830_v16, %v829_v14  ;;  %v838_v20 = vsel %vm798_vm1, %v1504_v15, 0.0 }
 0x1b8   : > { %v839_v21 = vsel %vm798_vm1, %v1506_v18, 0.0  ;;  %1466 = vmatprep.subr.bf16.mxu0 %v1465_v17  ;;  %v1469_v22 = vpack.c.bf16 %v1506_v18, %v1504_v15 }
 0x1b9   : > { %v840_v23 = vadd.f32 %v839_v21, %v838_v20  ;;  %1468 = vmatpush3.bf16.msra.mxu0 %v1465_v17  ;;  %v832_v38 = vrot.slane %v831_v19, 4 }
 0x1ba   : > { %1470 = vmatprep.subr.bf16.mxu1 %v1469_v22 }
 0x1bb   : > { %1472 = vmatpush3.bf16.msra.mxu1 %v1469_v22  ;;  %v841_v39 = vrot.slane %v840_v23, 4  ;;  %v833_v40 = vadd.f32 %v832_v38, %v831_v19 }
 0x1bc   : > { %1406 = vmatmul.mubr.msk.f32.vlgmr.msra.gmra.mrb[2].mxu0 %vm798_vm1, %v540_v24 }
 0x1bd   : > { %1408 = vmatprep.mubr.msk.f32.mxu0 %vm798_vm1, %v541_v25  ;;  %v842_v41 = vadd.f32 %v841_v39, %v840_v23  ;;  %v834_v42 = vrot.slane %v833_v40, 2 }
 0x1be   : > { %1422 = vmatmul.mubr.msk.f32.vlgmr.msra.gmra.mrb[2].mxu1 %vm798_vm1, %v548_v26 }
 0x1bf   : > { %1424 = vmatprep.mubr.msk.f32.mxu1 %vm798_vm1, %v549_v27  ;;  %v843_v43 = vrot.slane %v842_v41, 2  ;;  %v835_v44 = vadd.f32 %v834_v42, %v833_v40 }
 0x1c0   : > { %1409 = vmatmul.mubr.msk.f32.gmra.mrb[4].mxu0 %vm798_vm1, %v542_v28 }
 0x1c1   : > { %1411 = vmatprep.mubr.msk.f32.mxu0 %vm798_vm1, %v543_v29  ;;  %v844_v45 = vadd.f32 %v843_v43, %v842_v41  ;;  %v836_v46 = vrot.slane %v835_v44, 1 }
 0x1c2   : > { %1425 = vmatmul.mubr.msk.f32.gmra.mrb[4].mxu1 %vm798_vm1, %v550_v30 }
 0x1c3   : > { %1427 = vmatprep.mubr.msk.f32.mxu1 %vm798_vm1, %v551_v31  ;;  %v845_v47 = vrot.slane %v844_v45, 1  ;;  %v837_v48 = vadd.f32 %v836_v46, %v835_v44 }
 0x1c4   : > { %1412 = vmatmul.mubr.msk.f32.gmra.mrb[6].mxu0 %vm798_vm1, %v544_v32 }
 0x1c5   : > { %1414 = vmatprep.mubr.msk.f32.mxu0 %vm798_vm1, %v545_v33  ;;  %v846_v49 = vadd.f32 %v845_v47, %v844_v45  ;;  %1507 = vrcp.f32 %v837_v48 }
 0x1c6   : > { %1428 = vmatmul.mubr.msk.f32.gmra.mrb[6].mxu1 %vm798_vm1, %v552_v34 }
 0x1c7   : > { %1430 = vmatprep.mubr.msk.f32.mxu1 %vm798_vm1, %v553_v35  ;;  %1509 = vrcp.f32 %v846_v49 }
 0x1c8   : > { %1415 = vmatmul.mubr.msk.f32.gmra.mrb[8].mxu0 %vm798_vm1, %v546_v36 }
 0x1ca   : > { %1431 = vmatmul.mubr.msk.f32.gmra.mrb[8].mxu1 %vm798_vm1, %v554_v37 }
 0x1cf   : > { %v1508_v50 = vpop.eup %1507 }
 0x1d0   : > { %v1107_v52 = vmul.f32 %v1508_v50, %v837_v48 }
 0x1d1   : > { %v1510_v51 = vpop.eup %1509 }
 0x1d2   : > { %v1108_v53 = vmul.f32 %v1510_v51, %v846_v49  ;;  %v1109_v54 = vsub.f32 2.0, %v1107_v52 }
 0x1d4   : > { %v1110_v55 = vsub.f32 2.0, %v1108_v53  ;;  %v1111_v56 = vmul.f32 %v1508_v50, %v1109_v54 }
 0x1d6   : > { %v1112_v58 = vmul.f32 %v1510_v51, %v1110_v55 }
 0x28f   : > { %v1407_v57 = vpop.f32.mrb[2].mxu0 }
 0x290   : > { %v1114_v59 = vmul.f32 %v1407_v57, %v1111_v56  ;;  %v937_v60 = vpop.f32.mrb[3].mxu0 }
 0x291   : > { %v1423_v61 = vpop.f32.mrb[2].mxu1  ;;  %v1113_v62 = vmul.f32 %v1111_v56, %v937_v60 }
 0x292   : > { %1130 = vst.msk [vmem:[%s1754_s29 + $0x8] sm:$0xff] %vm798_vm1, %v1114_v59  ;;  %v1122_v63 = vmul.f32 %v1423_v61, %v1112_v58  ;;  %v1066_v0 = vpop.f32.mrb[3].mxu1 }
 0x293   : > { %1129 = vst.msk [vmem:[%s1754_s29] sm:$0xff] %vm798_vm1, %v1113_v62  ;;  %v1121_v1 = vmul.f32 %v1112_v58, %v1066_v0  ;;  %v1410_v2 = vpop.f32.mrb[4].mxu0 }
 0x294   : > { %1138 = vst.msk [vmem:[%s1754_s29 + $0x48] sm:$0xff] %vm798_vm1, %v1122_v63  ;;  %v1116_v3 = vmul.f32 %v1410_v2, %v1111_v56  ;;  %v947_v4 = vpop.f32.mrb[5].mxu0 }
 0x295   : > { %1137 = vst.msk [vmem:[%s1754_s29 + $0x40] sm:$0xff] %vm798_vm1, %v1121_v1  ;;  %v1426_v5 = vpop.f32.mrb[4].mxu1  ;;  %v1115_v6 = vmul.f32 %v1111_v56, %v947_v4 }
 0x296   : > { %1132 = vst.msk [vmem:[%s1754_s29 + $0x18] sm:$0xff] %vm798_vm1, %v1116_v3  ;;  %v1124_v7 = vmul.f32 %v1426_v5, %v1112_v58  ;;  %v1076_v8 = vpop.f32.mrb[5].mxu1 }
 0x297   : > { %1131 = vst.msk [vmem:[%s1754_s29 + $0x10] sm:$0xff] %vm798_vm1, %v1115_v6  ;;  %v1123_v9 = vmul.f32 %v1112_v58, %v1076_v8  ;;  %v1413_v10 = vpop.f32.mrb[6].mxu0 }
 0x298   : > { %1140 = vst.msk [vmem:[%s1754_s29 + $0x58] sm:$0xff] %vm798_vm1, %v1124_v7  ;;  %v1118_v11 = vmul.f32 %v1413_v10, %v1111_v56  ;;  %v957_v12 = vpop.f32.mrb[7].mxu0 }
 0x299   : > { %1139 = vst.msk [vmem:[%s1754_s29 + $0x50] sm:$0xff] %vm798_vm1, %v1123_v9  ;;  %v1429_v13 = vpop.f32.mrb[6].mxu1  ;;  %v1117_v14 = vmul.f32 %v1111_v56, %v957_v12 }
 0x29a   : > { %1134 = vst.msk [vmem:[%s1754_s29 + $0x28] sm:$0xff] %vm798_vm1, %v1118_v11  ;;  %v1126_v15 = vmul.f32 %v1429_v13, %v1112_v58  ;;  %v1086_v16 = vpop.f32.mrb[7].mxu1 }
 0x29b   : > { %1133 = vst.msk [vmem:[%s1754_s29 + $0x20] sm:$0xff] %vm798_vm1, %v1117_v14  ;;  %v1125_v17 = vmul.f32 %v1112_v58, %v1086_v16  ;;  %v1416_v18 = vpop.f32.mrb[8].mxu0 }
 0x29c   : > { %1142 = vst.msk [vmem:[%s1754_s29 + $0x68] sm:$0xff] %vm798_vm1, %v1126_v15  ;;  %v1120_v19 = vmul.f32 %v1416_v18, %v1111_v56  ;;  %v967_v20 = vpop.f32.mrb[9].mxu0 }
 0x29d   : > { %1141 = vst.msk [vmem:[%s1754_s29 + $0x60] sm:$0xff] %vm798_vm1, %v1125_v17  ;;  %v1432_v21 = vpop.f32.mrb[8].mxu1  ;;  %v1119_v22 = vmul.f32 %v1111_v56, %v967_v20 }
 0x29e   : > { %1136 = vst.msk [vmem:[%s1754_s29 + $0x38] sm:$0xff] %vm798_vm1, %v1120_v19  ;;  %v1128_v23 = vmul.f32 %v1432_v21, %v1112_v58  ;;  %v1096_v24 = vpop.f32.mrb[9].mxu1 }
 0x29f   : > { %1135 = vst.msk [vmem:[%s1754_s29 + $0x30] sm:$0xff] %vm798_vm1, %v1119_v22  ;;  %v1127_v25 = vmul.f32 %v1112_v58, %v1096_v24 }
 0x2a0   : > { %1144 = vst.msk [vmem:[%s1754_s29 + $0x78] sm:$0xff] %vm798_vm1, %v1128_v23 }
 0x2a1   : > { %1143 = vst.msk [vmem:[%s1754_s29 + $0x70] sm:$0xff] %vm798_vm1, %v1127_v25 }
 0x2a2 PF: > { %p10_p9 = scmp.ge.s32.totalorder %s1572_s16, 6   ;;  %s1803_s12 = smov %s1529_s13 }
 0x2a3   : > { %s1804_s13 = smov %s1581_s19  ;;  %s1805_s14 = smov %s1572_s16 }
 0x2a4   :  { %12 = sbr.rel (!%p10_p9) target bundleno = 2 (0x2), region = 197 }

</bundles_post_ra>
